<compile_context>
chip_gen: v7x
topology: tpu7x:2x2x1
jax: 0.10.0
libtpu: 0.0.40
codegen_flags: <defaults>
</compile_context>

<pallas_src>
import jax
import jax.numpy as jnp
from jax.experimental import pallas as pl
from jax.experimental.pallas import tpu as pltpu


# ----------------------------- tiling helpers ---------------------------------------


def _pick_lane_tile(L, cap):
    """Largest multiple-of-128 divisor of L that is <= cap; fall back to full L."""
    t = (min(cap, L) // 128) * 128
    while t >= 128:
        if L % t == 0:
            return t
        t -= 128
    # TODO(synk): for large non-128-divisible L, pad L to a multiple of 128 instead of a
    # full-length tile (keeps blocks small and small-N grids >= 2 steps for v7x 2-TC).
    return L


def _pick_k_tile(C, cap=512):
    """Contraction (channel) tile: largest multiple-of-128 divisor of C <= cap, else full C."""
    t = (min(cap, C) // 128) * 128
    while t >= 128:
        if C % t == 0:
            return t
        t -= 128
    return C


def _pick_spread_chunk(TL, cap=256):
    """Fixed lane-chunk for the nearest-2x spread matmul (must divide TL)."""
    for t in (cap, 128):
        if t <= TL and TL % t == 0:
            return t
    return TL


def _vmem_capacity_bytes():
    """Physical VMEM per TensorCore; conservative fallback if the query is unavailable."""
    try:
        return int(pltpu.get_tpu_info().vmem_capacity_bytes)
    except Exception:
        return 64 * 1024 * 1024  # v7x per-TC size; safe lower bound for v5e/v6e too


# ----------------------------- kernel ------------------------------------------------


def _make_kernel(c_out, c_r, tl, tkc):
    """Per-(batch, lane-tile, k-tile) kernel body. All sizes are static Python ints."""
    n_chunks = tl // tkc

    def kernel(x_ref, r_ref, w_ref, b_ref, s_ref, o_ref, acc_ref):
        # x_ref  : (CK, TL)        input tile at ORIGINAL length (no pre-upsampling)
        # r_ref  : (Cr, 2*TL)      skip-connection tile
        # w_ref  : (Co, CK)        1x1 conv weight tile (kernel-size-1 conv == channel matmul)
        # b_ref  : (Co, 1)         conv bias (resident, constant index_map)
        # s_ref  : (TKc, 2*TKc)    0/1 spread matrix: S[i, 2i] = S[i, 2i+1] = 1 (out dtype)
        # o_ref  : (Co+Cr, 2*TL)   output tile: [conv result ; r]
        # acc_ref: (Co, TL) f32    contraction accumulator (resident across the K axis)
        k = pl.program_id(2)

        @pl.when(k == 0)
        def _():
            acc_ref[...] = jnp.zeros_like(acc_ref)

        acc_ref[...] += jnp.dot(w_ref[...], x_ref[...],
                                preferred_element_type=jnp.float32)

        @pl.when(k == pl.num_programs(2) - 1)
        def _():
            b = b_ref[...].astype(jnp.float32)   # (Co, 1), broadcast-add
            s = s_ref[...]                       # (TKc, 2*TKc) in output dtype
            # Chunked nearest-2x spread: small fixed-size MXU pass per lane chunk, stored
            # immediately (bounds the live f32/out-dtype intermediate to (Co, 2*TKc)).
            for c in range(n_chunks):            # tiny static trip count
                yc = acc_ref[:, c * tkc:(c + 1) * tkc] + b          # (Co, TKc) f32
                yc = yc.astype(o_ref.dtype)      # exact: S is 0/1 and output is cast anyway
                zc = jnp.dot(yc, s, preferred_element_type=jnp.float32)   # (Co, 2*TKc)
                o_ref[pl.ds(0, c_out), pl.ds(c * 2 * tkc, 2 * tkc)] = zc.astype(o_ref.dtype)
            # Skip-connection slab: sublane-aligned (unmasked stores) whenever Co % 8 == 0,
            # which holds for all realistic C (>= 16).
            o_ref[pl.ds(c_out, c_r), :] = r_ref[...]

    return kernel


# ----------------------------- wrapper ------------------------------------------------


def upsampling_forward(x, r, weight, bias, *, lane_tile=None, k_tile=512, spread_chunk=256):
    """x: (N, C, L), r: (N, Cr, 2L), weight: (C//2, C), bias: (C//2,).

    Returns (N, C//2 + Cr, 2L) == torch.cat((Conv1d(interpolate(x, 2, 'nearest')), r), 1).
    """
    N, C, L = x.shape
    Co = weight.shape[0]          # C // 2
    Cr = r.shape[1]
    L2 = 2 * L
    assert weight.shape == (Co, C)
    assert bias.shape == (Co,)
    assert r.shape == (N, Cr, L2)
    assert r.dtype == x.dtype, "x and r must share a dtype (concat target dtype)"

    vmem_cap = _vmem_capacity_bytes()
    if lane_tile is None:
        # v5e/v6e (128 MiB VMEM): larger streaming tiles amortize per-grid-step overhead.
        # v7x (64 MiB VMEM): 512-lane input tiles (output stores are still 1024 lanes).
        lane_tile = 512 if vmem_cap <= 64 * 1024 * 1024 else 1024

    TL = _pick_lane_tile(L, lane_tile)
    CK = _pick_k_tile(C, k_tile)
    TKc = _pick_spread_chunk(TL, spread_chunk)
    n_l = L // TL
    n_k = C // CK

    out_dtype = x.dtype
    itm = jnp.dtype(out_dtype).itemsize
    w_itm = jnp.dtype(weight.dtype).itemsize

    # 0/1 spread matrix implementing nearest-2x duplication along the lane axis, built in
    # the output dtype so the second MXU pass runs at bf16 rate for bf16 inputs (exact).
    cols = jnp.arange(2 * TKc)[None, :]
    rows = jnp.arange(TKc)[:, None]
    spread = (cols // 2 == rows).astype(out_dtype)           # (TKc, 2*TKc)

    b2d = bias.reshape(Co, 1)                                 # native dtype

    # VMEM budget from actual block footprints (streamed inputs/outputs double-buffered),
    # with 1.5x headroom, clamped to [32 MiB, 64 MiB] so it is valid on every generation.
    need = (2 * CK * TL * itm                     # x blocks
            + 2 * Cr * 2 * TL * itm               # r blocks
            + 2 * (Co + Cr) * 2 * TL * itm        # out blocks
            + 2 * Co * CK * w_itm                 # weight blocks (resident)
            + 2 * Co * itm                        # bias (tiny)
            + 2 * TKc * 2 * TKc * itm             # spread (resident)
            + Co * TL * 4)                        # f32 accumulator scratch
    vmem_limit = int(min(max(need * 3 // 2 + (4 << 20), 32 << 20), 64 << 20))

    kernel = _make_kernel(Co, Cr, TL, TKc)

    out = pl.pallas_call(
        kernel,
        out_shape=jax.ShapeDtypeStruct((N, Co + Cr, L2), out_dtype),
        grid_spec=pltpu.PrefetchScalarGridSpec(
            num_scalar_prefetch=0,
            grid=(N, n_l, n_k),                   # reduction (K) axis last, innermost
            in_specs=[
                pl.BlockSpec((None, CK, TL), lambda n, j, k: (n, k, j)),       # x
                pl.BlockSpec((None, Cr, 2 * TL), lambda n, j, k: (n, 0, j)),   # r
                pl.BlockSpec((Co, CK), lambda n, j, k: (0, k)),                # weight
                pl.BlockSpec((Co, 1), lambda n, j, k: (0, 0)),                 # bias, resident
                pl.BlockSpec((TKc, 2 * TKc), lambda n, j, k: (0, 0)),          # spread, resident
            ],
            out_specs=pl.BlockSpec((None, Co + Cr, 2 * TL), lambda n, j, k: (n, 0, j)),
            scratch_shapes=[pltpu.VMEM((Co, TL), jnp.float32)],
        ),
        compiler_params=pltpu.CompilerParams(
            dimension_semantics=("parallel", "parallel", "arbitrary"),
            vmem_limit_bytes=vmem_limit,
        ),
    )(x, r, weight, b2d, spread)
    return out


# ----------------------------- reference & harness ------------------------------------


def _reference(x, r, weight, bias):
    up = jnp.repeat(x, 2, axis=-1)
    y = jnp.einsum("oc,ncl->nol", weight, up) + bias[None, :, None]
    return jnp.concatenate([y, r], axis=1)


if __name__ == "__main__":
    key = jax.random.PRNGKey(0)
    k_x, k_r, k_w, k_b = jax.random.split(key, 4)

    N, C, L = 2, 4, 8          # x: (N, C, L);  r: (N, C//2, 2L)
    Co = C // 2

    x = jax.random.normal(k_x, (N, C, L), dtype=jnp.float32)
    r = jax.random.normal(k_r, (N, Co, 2 * L), dtype=jnp.float32)

    # Deterministic synthetic parameters (shapes from nn.Conv1d(C, C//2, 1, 1)).
    bound = 1.0 / (C ** 0.5)
    weight = jax.random.uniform(k_w, (Co, C), jnp.float32, -bound, bound)  # (C//2, C, 1) squeezed
    bias = jax.random.uniform(k_b, (Co,), jnp.float32, -bound, bound)

    out = upsampling_forward(x, r, weight, bias)
    out = jax.block_until_ready(out)

    ref = _reference(x, r, weight, bias)
    assert out.shape == (N, Co + Co, 2 * L)
    assert jnp.allclose(out, ref, atol=1e-5, rtol=1e-5)

    print("KERNEL_OK")
</pallas_src>

<mosaic_0001>
module attributes {stable_mosaic.version = 11 : i64} {
  func.func @kernel(%arg0: i32, %arg1: i32, %arg2: i32, %arg3: memref<1x4x8xf32, #tpu.memory_space<vmem>>, %arg4: memref<1x2x16xf32, #tpu.memory_space<vmem>>, %arg5: memref<2x4xf32, #tpu.memory_space<vmem>>, %arg6: memref<2x1xf32, #tpu.memory_space<vmem>>, %arg7: memref<8x16xf32, #tpu.memory_space<vmem>>, %arg8: memref<1x4x16xf32, #tpu.memory_space<vmem>>, %arg9: memref<2x8xf32, #tpu.memory_space<vmem>>) attributes {dimension_semantics = [#tpu.dimension_semantics<parallel>, #tpu.dimension_semantics<parallel>, #tpu.dimension_semantics<arbitrary>], iteration_bounds = array<i64: 2, 1, 1>, scalar_prefetch = 0 : i64, scratch_operands = 1 : i64, tpu.core_type = #tpu.core_type<tc>, window_params = [{transform_indices = @transform_0, window_bounds = array<i64: 1, 4, 8>}, {transform_indices = @transform_1, window_bounds = array<i64: 1, 2, 16>}, {transform_indices = @transform_2, window_bounds = array<i64: 2, 4>}, {pipeline_mode = #tpu.pipeline_mode<synchronous>, transform_indices = @transform_3, window_bounds = array<i64: 2, 1>}, {pipeline_mode = #tpu.pipeline_mode<synchronous>, transform_indices = @transform_4, window_bounds = array<i64: 8, 16>}, {transform_indices = @transform_5, window_bounds = array<i64: 1, 4, 16>}]} {
    %c0_i32 = arith.constant 0 : i32
    %0 = arith.cmpi eq, %arg2, %c0_i32 : i32
    %1 = arith.extui %0 : i1 to i32
    %c0_i32_0 = arith.constant 0 : i32
    %2 = arith.cmpi ne, %1, %c0_i32_0 : i32
    scf.if %2 {
      %cst_11 = arith.constant 0.000000e+00 : f32
      %13 = vector.broadcast %cst_11 : f32 to vector<2x8xf32>
      %c0_12 = arith.constant 0 : index
      %c0_13 = arith.constant 0 : index
      %14 = vector.load %arg9[%c0_12, %c0_13] : memref<2x8xf32, #tpu.memory_space<vmem>>, vector<2x8xf32>
      tpu.vector_store %arg9[%c0_12, %c0_13], %13 {strides = array<i32>} : memref<2x8xf32, #tpu.memory_space<vmem>>, vector<2x8xf32>,
    } else {
    }
    %c0 = arith.constant 0 : index
    %c0_1 = arith.constant 0 : index
    %3 = vector.load %arg9[%c0, %c0_1] : memref<2x8xf32, #tpu.memory_space<vmem>>, vector<2x8xf32>
    %c0_2 = arith.constant 0 : index
    %c0_3 = arith.constant 0 : index
    %4 = vector.load %arg5[%c0_2, %c0_3] : memref<2x4xf32, #tpu.memory_space<vmem>>, vector<2x4xf32>
    %c0_4 = arith.constant 0 : index
    %c0_5 = arith.constant 0 : index
    %c0_6 = arith.constant 0 : index
    %5 = vector.load %arg3[%c0_4, %c0_5, %c0_6] : memref<1x4x8xf32, #tpu.memory_space<vmem>>, vector<1x4x8xf32>
    %6 = vector.shape_cast %5 : vector<1x4x8xf32> to vector<4x8xf32>
    %cst = arith.constant dense<0.000000e+00> : vector<2x8xf32>
    %7 = tpu.matmul %4, %6, %cst {dimension_numbers = #tpu.dot_dimension_numbers<[1], [0], [0], [1], [0, 0, 1, 1], [], []>} : vector<2x4xf32>, vector<4x8xf32>, vector<2x8xf32> -> vector<2x8xf32>
    %8 = arith.addf %3, %7 : vector<2x8xf32>
    %c0_7 = arith.constant 0 : index
    %c0_8 = arith.constant 0 : index
    %9 = vector.load %arg9[%c0_7, %c0_8] : memref<2x8xf32, #tpu.memory_space<vmem>>, vector<2x8xf32>
    tpu.vector_store %arg9[%c0_7, %c0_8], %8 {strides = array<i32>} : memref<2x8xf32, #tpu.memory_space<vmem>>, vector<2x8xf32>,
    %c0_i32_9 = arith.constant 0 : i32
    %10 = arith.cmpi eq, %arg2, %c0_i32_9 : i32
    %11 = arith.extui %10 : i1 to i32
    %c0_i32_10 = arith.constant 0 : i32
    %12 = arith.cmpi ne, %11, %c0_i32_10 : i32
    scf.if %12 {
      %c0_11 = arith.constant 0 : index
      %c0_12 = arith.constant 0 : index
      %13 = vector.load %arg6[%c0_11, %c0_12] : memref<2x1xf32, #tpu.memory_space<vmem>>, vector<2x1xf32>
      %c0_13 = arith.constant 0 : index
      %c0_14 = arith.constant 0 : index
      %14 = vector.load %arg7[%c0_13, %c0_14] : memref<8x16xf32, #tpu.memory_space<vmem>>, vector<8x16xf32>
      %c0_15 = arith.constant 0 : index
      %c0_16 = arith.constant 0 : index
      %15 = vector.load %arg9[%c0_15, %c0_16] : memref<2x8xf32, #tpu.memory_space<vmem>>, vector<2x8xf32>
      %16 = vector.broadcast %13 : vector<2x1xf32> to vector<2x8xf32>
      %17 = arith.addf %15, %16 : vector<2x8xf32>
      %cst_17 = arith.constant dense<0.000000e+00> : vector<2x16xf32>
      %18 = tpu.matmul %17, %14, %cst_17 {dimension_numbers = #tpu.dot_dimension_numbers<[1], [0], [0], [1], [0, 0, 1, 1], [], []>} : vector<2x8xf32>, vector<8x16xf32>, vector<2x16xf32> -> vector<2x16xf32>
      %c0_18 = arith.constant 0 : index
      %c0_19 = arith.constant 0 : index
      %c0_20 = arith.constant 0 : index
      %19 = vector.load %arg8[%c0_18, %c0_19, %c0_20] : memref<1x4x16xf32, #tpu.memory_space<vmem>>, vector<1x2x16xf32>
      %20 = vector.shape_cast %19 : vector<1x2x16xf32> to vector<2x16xf32>
      %21 = vector.shape_cast %18 : vector<2x16xf32> to vector<1x2x16xf32>
      tpu.vector_store %arg8[%c0_18, %c0_19, %c0_20], %21 {strides = array<i32>} : memref<1x4x16xf32, #tpu.memory_space<vmem>>, vector<1x2x16xf32>,
      %c0_21 = arith.constant 0 : index
      %c0_22 = arith.constant 0 : index
      %c0_23 = arith.constant 0 : index
      %22 = vector.load %arg4[%c0_21, %c0_22, %c0_23] : memref<1x2x16xf32, #tpu.memory_space<vmem>>, vector<1x2x16xf32>
      %23 = vector.shape_cast %22 : vector<1x2x16xf32> to vector<2x16xf32>
      %c0_24 = arith.constant 0 : index
      %c2 = arith.constant 2 : index
      %c0_25 = arith.constant 0 : index
      %24 = vector.load %arg8[%c0_24, %c2, %c0_25] : memref<1x4x16xf32, #tpu.memory_space<vmem>>, vector<1x2x16xf32>
      %25 = vector.shape_cast %24 : vector<1x2x16xf32> to vector<2x16xf32>
      %26 = vector.shape_cast %23 : vector<2x16xf32> to vector<1x2x16xf32>
      tpu.vector_store %arg8[%c0_24, %c2, %c0_25], %26 {strides = array<i32>} : memref<1x4x16xf32, #tpu.memory_space<vmem>>, vector<1x2x16xf32>,
    } else {
    }
    return
  }
  func.func @transform_0(%arg0: i32, %arg1: i32, %arg2: i32) -> (i32, i32, i32) {
    %c0_i32 = arith.constant 0 : i32
    return %arg0, %arg2, %arg1 : i32, i32, i32
  }
  func.func @transform_1(%arg0: i32, %arg1: i32, %arg2: i32) -> (i32, i32, i32) {
    %c0_i32 = arith.constant 0 : i32
    %c0_i32_0 = arith.constant 0 : i32
    return %arg0, %c0_i32, %arg1 : i32, i32, i32
  }
  func.func @transform_2(%arg0: i32, %arg1: i32, %arg2: i32) -> (i32, i32) {
    %c0_i32 = arith.constant 0 : i32
    %c0_i32_0 = arith.constant 0 : i32
    return %c0_i32, %arg2 : i32, i32
  }
  func.func @transform_3(%arg0: i32, %arg1: i32, %arg2: i32) -> (i32, i32) {
    %c0_i32 = arith.constant 0 : i32
    %c0_i32_0 = arith.constant 0 : i32
    %c0_i32_1 = arith.constant 0 : i32
    return %c0_i32, %c0_i32_0 : i32, i32
  }
  func.func @transform_4(%arg0: i32, %arg1: i32, %arg2: i32) -> (i32, i32) {
    %c0_i32 = arith.constant 0 : i32
    %c0_i32_0 = arith.constant 0 : i32
    %c0_i32_1 = arith.constant 0 : i32
    return %c0_i32, %c0_i32_0 : i32, i32
  }
  func.func @transform_5(%arg0: i32, %arg1: i32, %arg2: i32) -> (i32, i32, i32) {
    %c0_i32 = arith.constant 0 : i32
    %c0_i32_0 = arith.constant 0 : i32
    return %arg0, %c0_i32, %arg1 : i32, i32, i32
  }
}

</mosaic_0001>

<bundles_post_ra>
// kernel: tpu_custom_call.1
= control target key start
LH: loop header
LB: loop body
LE: loop exit
PB: predicated region body
PF: predicated region fallthrough
CT: control target
= control target key end

     0   :  { %10 = vsyncpa [#allocation4], 0  ;;  %s1060_s0 = inlined_call_operand.hbm [shape: f32[2,4,8], index: 0, kind: input, shape index: {}]   ;;  %s1061_s1 = inlined_call_operand.vmem [shape: f32[2,2,16], index: 1, kind: input, shape index: {}]   ;;  %s1062_s2 = inlined_call_operand.vmem [shape: f32[2,4], index: 2, kind: input, shape index: {}]   ;;  %s1063_s3 = inlined_call_operand.vmem [shape: f32[2,1], index: 3, kind: input, shape index: {}]   ;;  %s1064_s4 = inlined_call_operand.vmem [shape: f32[8,16], index: 4, kind: input, shape index: {}]   ;;  %s1065_s5 = inlined_call_operand.hbm [shape: f32[2,4,16], index: 5, kind: output, shape index: {}]  }
   0x1   :  { %12 = vsyncpa [#allocation4 + $0x1], 0 }
   0x2   :  { %13 = vsyncpa [#allocation5], 0 }
   0x3   :  { %15 = vsyncpa [#allocation5 + $0x1], 0  ;;  %s868_s18 = smov 0   ;;  %s870_s19 = smov 0  }
   0x4   :  { %s872_s20 = smov 0   ;;  %s874_s21 = smov 0  }
   0x5   :  { %s876_s22 = smov 0   ;;  %s878_s23 = smov 0  }
   0x6 LB: > { %s621_s24 = sadd.s32 4294967295, %s831_s23   ;;  %s622_s25 = sadd.s32 4294967294, %s831_s23   ;;  %s831_s23 = sphi %s878_s23, %s21_s23   ;;  %s827_s22 = sphi %s876_s22, %s1081_s22   ;;  %s823_s21 = sphi %s874_s21, %s1080_s21   ;;  %s819_s20 = sphi %s872_s20, %s1079_s20   ;;  %s815_s19 = sphi %s870_s19, %s1078_s19   ;;  %s811_s18 = sphi %s868_s18, %s1077_s18  }
   0x7   : > { %s40_s26 = sadd.s32 1, %s827_s22  ;;  %s51_s27 = sadd.s32 1, %s819_s20 }
   0x8   : > { %p42_p0 = scmp.ge.s32.totalorder %s40_s26, 2  ;;  %p58_p1 = scmp.ne.s32.totalorder %s819_s20, %s815_s19 }
   0x9   : > { %p59_p2 = scmp.eq.s32.totalorder %s831_s23, 0  ;;  %p64_p3 = scmp.ne.s32.totalorder %s815_s19, %s811_s18 }
   0xa   : > { %s1083_s26 = smov (%p42_p0, %s40_s26), 0  ;;  %p65_p5 = scmp.eq.s32.totalorder %s621_s24, 0 }
   0xb   : > { %p909_p4 = por %p59_p2, %p58_p1  ;;  %s44_s29 = ssub.s32 %s827_s22, %s1083_s26 }
   0xc   : > { %p186_p6 = scmp.eq.s32.totalorder %s621_s24, 1  ;;  %p49_p7 = scmp.eq.s32.totalorder %s44_s29, 0 }
   0xd   : > { %p915_p8 = por %p65_p5, %p64_p3  ;;  %p192_p10 = scmp.eq.s32.totalorder %s622_s25, 1 }
   0xe   : > { %p919_p9 = por %p186_p6, %p58_p1  ;;  %p665_p13 = scmp.lt.s32.totalorder %s831_s23, 2 }
   0xf   : > { %s924_s7 = scalar_select %p49_p7, %s819_s20, %s51_s27  }
  0x10   : > { %s1069_s6 = scalar_select %p919_p9, 1, 0 }
  0x11   : > { %p926_p11 = por %p192_p10, %p64_p3  ;;  %s225_s9 = sand.u32 1, %s819_s20  }
  0x12   : > { %s626_s10 = sshll.u32 %s225_s9, 2  ;;  %s627_s11 = sshll.u32 %s827_s22, 6 }
  0x13   : > { %s1070_s8 = scalar_select %p926_p11, 1, 0 }
  0x14   : > { %s937_s14 = scalar_lea.hbm %s1060_s0, %s627_s11  ;;  %s229_s15 = scalar_lea.vmem [#allocation3], %s626_s10 }
  0x15   : > { %s238_s16 = sshll.u32 %s229_s15, 4  ;;  %p943_p0 = pnand %p665_p13, %p909_p4  ;;  %s939_s16 = int_to_ptr.vmem [resolvable:$true] %s238_s16 }
  0x16   : > { %s226_s24 = scalar_lea.sflag [#allocation4], %s225_s9  ;;  %s719_s25 = scalar_lea.hbm %s937_s14, 64 }
  0x17   : > { %p720_p3 = scmp.ne.s32.totalorder %s937_s14, %s719_s25  ;;  %p721_p5 = pneg %p943_p0 }
  0x18   : > { %s724_s28 = scalar_lea.hbm %s1060_s0, 128  ;;  %p725_p4 = scmp.lt.u32.totalorder %s937_s14, %s1060_s0 }
  0x19   : > { %p722_p6 = pnand %p721_p5, %p720_p3  ;;  %p726_p10 = scmp.lt.u32.totalorder %s724_s28, %s719_s25 }
  0x1a   : > { %p728_p12 = scmp.lt.u32.totalorder %s719_s25, %s937_s14 }
  0x1b   : > { %p723_p7 = pneg %p722_p6  ;;  %p727_p13 = por %p726_p10, %p725_p4 }
  0x1d   : > { %p729_p1 = por %p728_p12, %p727_p13 }
  0x1f   : > { %p730_p2 = pnand %p729_p1, %p723_p7 }
  0x21   : > { %733 = shalt.err (!%p730_p2)
}
  0x22   : > { %s734_s9 = scalar_lea.vmem %s939_s16, 64  ;;  %s833_s12 = smov [#allocation3]  }
  0x23   : > { %p735_p3 = scmp.ne.s32.totalorder %s939_s16, %s734_s9  ;;  %s739_s13 = sshll.u32 %s833_s12, 4  ;;  %s740_s13 = int_to_ptr.vmem [resolvable:$false] %s739_s13 }
  0x24   : > { %s741_s15 = scalar_lea.vmem %s740_s13, 128  ;;  %p742_p9 = scmp.lt.s32.totalorder %s939_s16, %s740_s13 }
  0x25   : > { %p737_p6 = pnand %p735_p3, %p721_p5  ;;  %p743_p4 = scmp.lt.s32.totalorder %s741_s15, %s734_s9 }
  0x27   : > { %p738_p11 = pneg %p737_p6  ;;  %p744_p10 = por %p743_p4, %p742_p9 }
  0x29   : > { %p745_p12 = pnand %p744_p10, %p738_p11 }
  0x2b   : > { %748 = shalt.err (!%p745_p12)
}
  0x2c   : > { %660 = dma.hbm_to_vmem [thread:$0]  (!%p943_p0), %s937_s14, 64, %s939_s16, %s226_s24  }
  0x2d   : > { %p1072_p1 = scmp.lt.s32.totalorder %s831_s23, 3  ;;  %p1073_p2 = scmp.ge.s32.totalorder %s831_s23, 1 }
  0x2f   : > { %p254_p5 = pnand %p1073_p2, %p1072_p1 }
  0x30   : > { %s979_s25 = sand.u32 (!%p254_p5), 1, %s815_s19  }
  0x31   : > { %257 = sbr.rel (%p254_p5) target bundleno = 511 (0x1ff), region = 40  ;;  %s629_s27 = sshll.u32 (!%p254_p5), %s979_s25, 2 }
  0x32   : > { %s260_s29 = scalar_lea.sflag (!%p254_p5), [#allocation4], %s979_s25  ;;  %s263_s17 = scalar_lea.vmem (!%p254_p5), [#allocation3], %s629_s27 }
  0x38   : > { %802 = dma.done.wait (%p915_p8), %s260_s29, 64  }
  0x39   : > { %804 = vsyncadd (%p915_p8), %s260_s29, 4294967232  ;;  %vm316_vm0 = vcmask 58368   ;;  %v834_v0 = vmov 0.0   ;;  %vm835_vm1 = vmmov 0   ;;  %v836_v1 = vmov 0   ;;  %v406_v5 = vld [vmem:[%s1064_s4] sm:$0xff] }
  0x3a   : > { %317 = vst.msk [vmem:[#allocation2] sm:$0x3] %vm316_vm0, %v834_v0  ;;  %643 = vmatprep.subr.mxu0 %v834_v0  ;;  %645 = vmatprep.mubr.msk.f32.mxu0 %vm835_vm1, %v834_v0  ;;  %vm325_vm2 = vcmask 1043456   ;;  %vm321_vm3 = vcmask 31744   ;;  %v320_v2 = vld [vmem:[%s263_s17] sm:$0xf] }
  0x3b   : > { %718 = vset.pattern.permute.xlu0 %v836_v1  ;;  %648 = vmatprep.subr.mxu1 %v834_v0  ;;  %v319_v3 = vld [vmem:[%s1062_s2] sm:$0x3]  ;;  %vm414_vm4 = vcmask 64512   ;;  %p301_p8 = scmp.lt.s32.totalorder %s823_s21, 1  ;;  %vm488_vm5 = vcmask 123904   ;;  %s300_s29 = scalar_lea.vmem [#allocation6], %s629_s27 }
  0x3c   : > { %650 = vmatprep.mubr.msk.f32.mxu1 %vm835_vm1, %v834_v0  ;;  %v405_v4 = vld [vmem:[%s1063_s3] sm:$0x3]  ;;  %644 = vmatpush3.msk.msra.mxu0 %vm325_vm2, %v320_v2  ;;  %s636_s17 = sshll.u32 %s823_s21, 6  ;;  %s507_s14 = sshll.u32 %s300_s29, 4  ;;  %s1013_s14 = int_to_ptr.vmem [resolvable:$true] %s507_s14 }
  0x3d   : > { %410 = vperm.xlu0 %718, %v405_v4   ;;  %646 = vmatmul.mubr.msk.f32.vlgmr.msra.gmra.mrb[0].mxu0 %vm321_vm3, %v319_v3  ;;  %s302_s11 = scalar_select %p301_p8, %s823_s21, 1 }
  0x3e   : > { %649 = vmatpush3.msra.mxu1 %v406_v5  ;;  %s1011_s24 = scalar_lea.hbm %s1065_s5, %s636_s17  ;;  %s493_s28 = scalar_lea.sflag [#allocation5], %s979_s25 }
  0x3f   : > { %s631_s9 = sshll.u32 %s302_s11, 1  ;;  %s749_s10 = scalar_lea.vmem %s1013_s14, 64 }
  0x40   : > { %s307_s15 = scalar_lea.vmem %s1061_s1, %s631_s9  ;;  %p750_p9 = scmp.ne.s32.totalorder %s1013_s14, %s749_s10 }
  0x41   : > { %v318_v6 = vld [vmem:[#allocation2] sm:$0x3]  ;;  %p1074_p11 = scmp.ne.s32.totalorder %s1069_s6, 0  ;;  %s837_s21 = smov [#allocation6]  }
  0x42   : > { %v490_v13 = vld [vmem:[%s307_s15] sm:$0x3]  ;;  %s753_s27 = sshll.u32 %s837_s21, 4  ;;  %s754_s27 = int_to_ptr.vmem [resolvable:$false] %s753_s27 }
  0x43   : > { %491 = vst.msk [vmem:[%s300_s29 + $0x2] sm:$0x3] %vm488_vm5, %v490_v13  ;;  %p751_p0 = pnand %p750_p9, %p1074_p11  ;;  %s755_s11 = scalar_lea.vmem %s754_s27, 128 }
  0x44   : > { %p756_p13 = scmp.lt.s32.totalorder %s1013_s14, %s754_s27  ;;  %p757_p3 = scmp.lt.s32.totalorder %s755_s11, %s749_s10 }
  0x45   : > { %p752_p7 = pneg %p751_p0 }
  0x46   : > { %p758_p6 = por %p757_p3, %p756_p13 }
  0x48   : > { %p759_p4 = pnand %p758_p6, %p752_p7 }
  0xbc   : > { %v411_v10 = vpop.permute.xlu0 %410 }
 0x110   : > { %v395_v7 = vpop.f32.mrb[0].mxu0 }
 0x111   : > { %v399_v8 = vadd.f32 %v395_v7, %v318_v6  ;;  %v647_v9 = vpop.f32.mrb[1].mxu0 }
 0x113   : > { %401 = vst.msk [vmem:[#allocation2] sm:$0x3] %vm316_vm0, %v399_v8 }
 0x11a   : > { %v407_v11 = vld [vmem:[#allocation2] sm:$0x3] }
 0x11b   : > { %v413_v12 = vadd.f32 %v411_v10, %v407_v11 }
 0x11d   : > { %651 = vmatmul.mubr.msk.f32.vlgmr.msra.gmra.mrb[0].mxu1 %vm414_vm4, %v413_v12 }
 0x1f0   : > { %v484_v14 = vpop.f32.mrb[0].mxu1 }
 0x1f1   : > { %489 = vst.msk [vmem:[%s300_s29] sm:$0x3] %vm488_vm5, %v484_v14  ;;  %v652_v15 = vpop.f32.mrb[1].mxu1 }
 0x1f2   : > { %762 = shalt.err (!%p759_p4)
}
 0x1f3   : > { %s763_s25 = scalar_lea.hbm %s1011_s24, 64  ;;  %s767_s13 = scalar_lea.hbm %s1065_s5, 128 }
 0x1f4   : > { %p764_p10 = scmp.ne.s32.totalorder %s1011_s24, %s763_s25  ;;  %p768_p2 = scmp.lt.u32.totalorder %s1011_s24, %s1065_s5 }
 0x1f5   : > { %p769_p5 = scmp.lt.u32.totalorder %s767_s13, %s763_s25  ;;  %p771_p9 = scmp.lt.u32.totalorder %s763_s25, %s1011_s24 }
 0x1f6   : > { %p765_p12 = pnand %p764_p10, %p1074_p11 }
 0x1f7   : > { %p770_p8 = por %p769_p5, %p768_p2 }
 0x1f8   : > { %p766_p1 = pneg %p765_p12 }
 0x1f9   : > { %p772_p0 = por %p771_p9, %p770_p8 }
 0x1fb   : > { %p773_p7 = pnand %p772_p0, %p766_p1 }
 0x1fd   : > { %776 = shalt.err (!%p773_p7)
}
 0x1fe   : > { %655 = dma.vmem_to_hbm [thread:$0]  (%p1074_p11), %s1013_s14, 64, %s1011_s24, %s493_s28  }
 0x1ff PF: > { %s519_s17 = sand.u32 1, %s811_s18   ;;  %p1075_p13 = scmp.ne.s32.totalorder %s1070_s8, 0 }
 0x200   : > { %p1076_p3 = scmp.ge.s32.totalorder %s831_s23, 2  ;;  %s520_s16 = scalar_lea.sflag [#allocation5], %s519_s17 }
 0x202   : > { %p662_p6 = pnand %p1076_p3, %p1075_p13 }
 0x204   : > { %806 = dma.done.wait (!%p662_p6), %s520_s16, 64  }
 0x205   : > { %808 = vsyncadd (!%p662_p6), %s520_s16, 4294967232  ;;  %s21_s23 = sadd.s32 1, %s831_s23   ;;  %s1077_s18 = smov %s815_s19 }
 0x206   : > { %p18_p4 = scmp.ge.s32.totalorder %s21_s23, 4   ;;  %s1078_s19 = smov %s819_s20 }
 0x207   : > { %s1079_s20 = smov %s924_s7  ;;  %s1080_s21 = smov %s827_s22 }
 0x208   : > { %s1081_s22 = smov %s1083_s26  ;;  %20 = sbr.rel (!%p18_p4) target bundleno = 6 (0x6), region = 99 }
 0x20f   :  { %525 = vsyncpa [#allocation4], 1 }
 0x210   :  { %527 = vsyncpa [#allocation4 + $0x1], 1 }
 0x211   :  { %528 = vsyncpa [#allocation5], 1 }
 0x212   :  { %530 = vsyncpa [#allocation5 + $0x1], 1 }

</bundles_post_ra>
